<compile_context>
chip_gen: v7x
topology: tpu7x:2x2x1
jax: 0.10.0
libtpu: 0.0.40
codegen_flags: <defaults>
</compile_context>

<pallas_src>
import functools

import jax
import jax.numpy as jnp
from jax.experimental import pallas as pl
from jax.experimental.pallas import tpu as pltpu


def _fused_add_rmsnorm_kernel(x_ref, old_res_ref, w_ref, y_ref, new_res_ref,
                              *, eps, inv_n):
    # (TM, D) tile; all math in f32 as the Triton kernel does.
    new_res = x_ref[...].astype(jnp.float32) + old_res_ref[...].astype(jnp.float32)
    new_res_ref[...] = new_res.astype(new_res_ref.dtype)

    # Per-row inverse RMS: rsqrt is a (TM, 1) EUP op instead of a (TM, D) divide.
    sq_mean = jnp.sum(new_res * new_res, axis=-1, keepdims=True) * inv_n
    inv_rms = jax.lax.rsqrt(sq_mean + eps)                     # (TM, 1) f32

    w = w_ref[...]                                             # (1, D) weight dtype
    new_res = new_res * inv_rms                                # reuse the f32 buffer
    y_ref[...] = (new_res.astype(w.dtype) * w).astype(y_ref.dtype)


def _tpu_vmem_capacity_bytes():
    """Best-effort trace-time VMEM query; conservative (v7x-sized) fallback."""
    try:
        return int(pltpu.get_tpu_info().vmem_capacity_bytes)
    except Exception:
        return 64 * 1024 * 1024


def _vmem_plan():
    """Returns (block_budget_bytes, vmem_limit_bytes, min_grid_steps)."""
    cap = _tpu_vmem_capacity_bytes()
    if cap >= 96 * 1024 * 1024:
        # v5e / v6e: 128 MiB VMEM, single TensorCore -> huge blocks, no step clamp.
        return 48 * 1024 * 1024, 100 * 1024 * 1024, 1
    # v7x (64 MiB VMEM, 2 TCs) or unknown: smaller blocks, aim >=2 steps/core.
    return 20 * 1024 * 1024, 40 * 1024 * 1024, 4


def _choose_row_tile(m, d, dtype, budget, min_steps):
    """Row tile sized for VMEM + sublane packing; grid handles the tail via cdiv."""
    itemsize = jnp.dtype(dtype).itemsize
    sublane = {4: 8, 2: 16, 1: 32}.get(itemsize, 8)
    if m <= sublane:
        return m  # block equal to the full row extent (always legal)

    # VMEM per row: 4 tiled streams (x, old_res, y, new_res) double-buffered by
    # the BlockSpec pipeline, plus ~1-2 live f32 (TM, D) temporaries in the body.
    per_row = 4 * 2 * d * itemsize + 2 * d * 4
    tm = max(sublane, (budget // per_row // sublane) * sublane)
    tm = min(tm, (m // sublane) * sublane)                    # keep tm <= m

    # On megacore parts target at least `min_steps` grid steps so each core has
    # something to pipeline, but never shrink below ~256 rows (tiny blocks run
    # far below the HBM roofline).
    if min_steps > 1:
        per_step = -(-m // min_steps)                          # cdiv
        per_step = max(per_step, 256)
        per_step = ((per_step + sublane - 1) // sublane) * sublane
        tm = min(tm, per_step)

    return max(tm, sublane)


def fused_add_rmsnorm(hidden_states, old_residual, weight, eps=1e-6, *,
                      row_tile=None, donate_residual=False, donate_hidden=False):
    """hidden_states, old_residual: [..., D]; weight: [D].
    Returns (y, new_residual) with the shape/dtype of hidden_states."""
    input_shape = hidden_states.shape
    d = input_shape[-1]
    x2d = hidden_states.reshape(-1, d)
    r2d = old_residual.reshape(-1, d)
    m = x2d.shape[0]

    # NOTE: typical hidden sizes are multiples of 128 (lane-dense stores).  For
    # other D the full-extent last-dim block is still legal; no D padding is
    # done to avoid extra HBM traffic.
    budget, vmem_limit, min_steps = _vmem_plan()
    if row_tile is None:
        tm = _choose_row_tile(m, d, hidden_states.dtype, budget, min_steps)
    else:
        tm = max(1, min(int(row_tile), m))

    grid = (pl.cdiv(m, tm),)
    w2d = weight.reshape(1, d)

    kernel = functools.partial(_fused_add_rmsnorm_kernel,
                               eps=float(eps), inv_n=1.0 / float(d))

    # Optional in-place residual-stream semantics (matches the Triton module's
    # typical usage).  With no pad path the alias hits the caller's buffer.
    io_aliases = {}
    if donate_residual and old_residual.dtype == hidden_states.dtype:
        io_aliases[1] = 1          # old_residual -> new_residual
    if donate_hidden:
        io_aliases[0] = 0          # hidden_states -> y

    y2d, new_res2d = pl.pallas_call(
        kernel,
        grid=grid,
        in_specs=[
            pl.BlockSpec((tm, d), lambda i: (i, 0)),   # hidden_states tile
            pl.BlockSpec((tm, d), lambda i: (i, 0)),   # old_residual tile
            pl.BlockSpec((1, d), lambda i: (0, 0)),    # weight (resident, no re-DMA)
        ],
        out_specs=[
            pl.BlockSpec((tm, d), lambda i: (i, 0)),   # y
            pl.BlockSpec((tm, d), lambda i: (i, 0)),   # new_residual
        ],
        out_shape=[
            jax.ShapeDtypeStruct((m, d), hidden_states.dtype),
            jax.ShapeDtypeStruct((m, d), hidden_states.dtype),
        ],
        input_output_aliases=io_aliases,
        compiler_params=pltpu.CompilerParams(
            dimension_semantics=("parallel",),
            vmem_limit_bytes=vmem_limit,
        ),
    )(x2d, r2d, w2d)

    return y2d.reshape(input_shape), new_res2d.reshape(input_shape)


class TritonFusedAddRMSNormJax:
    """Mirror of the PyTorch module: weight initialized to ones(hidden_size)."""

    def __init__(self, hidden_size, eps=1e-6, dtype=jnp.float32):
        self.weight = jnp.ones((hidden_size,), dtype=dtype)
        self.eps = eps

    def __call__(self, hidden_states, old_residual):
        return fused_add_rmsnorm(hidden_states, old_residual, self.weight, self.eps)


def _reference(hidden_states, old_residual, weight, eps):
    x = hidden_states.astype(jnp.float32)
    r = old_residual.astype(jnp.float32)
    new_res = x + r
    rms_std = jnp.sqrt(jnp.mean(new_res * new_res, axis=-1, keepdims=True) + eps)
    hat = new_res / rms_std
    y = hat.astype(weight.dtype) * weight
    return y.astype(hidden_states.dtype), new_res.astype(hidden_states.dtype)


if __name__ == "__main__":
    bs, L, D = 2, 8, 32
    key = jax.random.PRNGKey(0)
    k1, k2 = jax.random.split(key)
    hidden_states = jax.random.normal(k1, (bs, L, D), dtype=jnp.float32)
    old_residual = jax.random.normal(k2, (bs, L, D), dtype=jnp.float32)

    mod = TritonFusedAddRMSNormJax(D, eps=1e-6)
    y, new_res = mod(hidden_states, old_residual)
    y = jax.block_until_ready(y)
    new_res = jax.block_until_ready(new_res)

    # Verify against a pure-JAX reference.
    y_ref, new_res_ref = _reference(hidden_states, old_residual, mod.weight, mod.eps)
    assert jnp.allclose(y, y_ref, atol=1e-5, rtol=1e-5), "y mismatch"
    assert jnp.allclose(new_res, new_res_ref, atol=1e-5, rtol=1e-5), "residual mismatch"

    print("KERNEL_OK")
</pallas_src>

<mosaic_0001>
module attributes {stable_mosaic.version = 11 : i64} {
  func.func @_fused_add_rmsnorm_kernel(%arg0: i32, %arg1: memref<16x32xf32, #tpu.memory_space<vmem>>, %arg2: memref<16x32xf32, #tpu.memory_space<vmem>>, %arg3: memref<1x32xf32, #tpu.memory_space<vmem>>, %arg4: memref<16x32xf32, #tpu.memory_space<vmem>>, %arg5: memref<16x32xf32, #tpu.memory_space<vmem>>) attributes {dimension_semantics = [#tpu.dimension_semantics<parallel>], iteration_bounds = array<i64: 1>, scalar_prefetch = 0 : i64, scratch_operands = 0 : i64, tpu.core_type = #tpu.core_type<tc>, window_params = [{transform_indices = @transform_0, window_bounds = array<i64: 16, 32>}, {transform_indices = @transform_1, window_bounds = array<i64: 16, 32>}, {pipeline_mode = #tpu.pipeline_mode<synchronous>, transform_indices = @transform_2, window_bounds = array<i64: 1, 32>}, {transform_indices = @transform_3, window_bounds = array<i64: 16, 32>}, {transform_indices = @transform_4, window_bounds = array<i64: 16, 32>}]} {
    %c0 = arith.constant 0 : index
    %c0_0 = arith.constant 0 : index
    %0 = vector.load %arg1[%c0, %c0_0] : memref<16x32xf32, #tpu.memory_space<vmem>>, vector<16x32xf32>
    %c0_1 = arith.constant 0 : index
    %c0_2 = arith.constant 0 : index
    %1 = vector.load %arg2[%c0_1, %c0_2] : memref<16x32xf32, #tpu.memory_space<vmem>>, vector<16x32xf32>
    %2 = arith.addf %0, %1 : vector<16x32xf32>
    %c0_3 = arith.constant 0 : index
    %c0_4 = arith.constant 0 : index
    %3 = vector.load %arg5[%c0_3, %c0_4] : memref<16x32xf32, #tpu.memory_space<vmem>>, vector<16x32xf32>
    tpu.vector_store %arg5[%c0_3, %c0_4], %2 {strides = array<i32>} : memref<16x32xf32, #tpu.memory_space<vmem>>, vector<16x32xf32>,
    %4 = arith.mulf %2, %2 : vector<16x32xf32>
    %cst = arith.constant dense<0.000000e+00> : vector<16xf32>
    %5 = vector.multi_reduction <add>, %4, %cst [1] : vector<16x32xf32> to vector<16xf32>
    %6 = vector.shape_cast %5 : vector<16xf32> to vector<16x1xf32>
    %cst_5 = arith.constant 3.125000e-02 : f32
    %7 = vector.broadcast %cst_5 : f32 to vector<16x1xf32>
    %8 = arith.mulf %6, %7 : vector<16x1xf32>
    %cst_6 = arith.constant 9.99999997E-7 : f32
    %9 = vector.broadcast %cst_6 : f32 to vector<16x1xf32>
    %10 = arith.addf %8, %9 : vector<16x1xf32>
    %11 = math.rsqrt %10 : vector<16x1xf32>
    %c0_7 = arith.constant 0 : index
    %c0_8 = arith.constant 0 : index
    %12 = vector.load %arg3[%c0_7, %c0_8] : memref<1x32xf32, #tpu.memory_space<vmem>>, vector<1x32xf32>
    %13 = vector.broadcast %11 : vector<16x1xf32> to vector<16x32xf32>
    %14 = arith.mulf %2, %13 : vector<16x32xf32>
    %15 = vector.broadcast %12 : vector<1x32xf32> to vector<16x32xf32>
    %16 = arith.mulf %14, %15 : vector<16x32xf32>
    %c0_9 = arith.constant 0 : index
    %c0_10 = arith.constant 0 : index
    %17 = vector.load %arg4[%c0_9, %c0_10] : memref<16x32xf32, #tpu.memory_space<vmem>>, vector<16x32xf32>
    tpu.vector_store %arg4[%c0_9, %c0_10], %16 {strides = array<i32>} : memref<16x32xf32, #tpu.memory_space<vmem>>, vector<16x32xf32>,
    return
  }
  func.func @transform_0(%arg0: i32) -> (i32, i32) {
    %c0_i32 = arith.constant 0 : i32
    %c0_i32_0 = arith.constant 0 : i32
    return %arg0, %c0_i32 : i32, i32
  }
  func.func @transform_1(%arg0: i32) -> (i32, i32) {
    %c0_i32 = arith.constant 0 : i32
    %c0_i32_0 = arith.constant 0 : i32
    return %arg0, %c0_i32 : i32, i32
  }
  func.func @transform_2(%arg0: i32) -> (i32, i32) {
    %c0_i32 = arith.constant 0 : i32
    %c0_i32_0 = arith.constant 0 : i32
    %c0_i32_1 = arith.constant 0 : i32
    return %c0_i32, %c0_i32_0 : i32, i32
  }
  func.func @transform_3(%arg0: i32) -> (i32, i32) {
    %c0_i32 = arith.constant 0 : i32
    %c0_i32_0 = arith.constant 0 : i32
    return %arg0, %c0_i32 : i32, i32
  }
  func.func @transform_4(%arg0: i32) -> (i32, i32) {
    %c0_i32 = arith.constant 0 : i32
    %c0_i32_0 = arith.constant 0 : i32
    return %arg0, %c0_i32 : i32, i32
  }
}

</mosaic_0001>

<bundles_post_ra>
// kernel: tpu_custom_call.1
= control target key start
LH: loop header
LB: loop body
LE: loop exit
PB: predicated region body
PF: predicated region fallthrough
CT: control target
= control target key end

     0   :  { %10 = vsyncpa [#allocation3], 0  ;;  %s323_s0 = inlined_call_operand.hbm [shape: f32[16,32], index: 0, kind: input, shape index: {}]   ;;  %s324_s1 = inlined_call_operand.hbm [shape: f32[16,32], index: 1, kind: input, shape index: {}]   ;;  %s325_s2 = inlined_call_operand.vmem [shape: f32[1,32], index: 2, kind: input, shape index: {}]   ;;  %s326_s3 = inlined_call_operand.hbm [shape: f32[16,32], index: 3, kind: output, shape index: {0}]   ;;  %s327_s4 = inlined_call_operand.hbm [shape: f32[16,32], index: 4, kind: output, shape index: {1}]  }
   0x1   :  { %11 = vsyncpa [#allocation6], 0 }
   0x2   :  { %12 = vsyncpa [#allocation4], 0 }
   0x3   :  { %13 = vsyncpa [#allocation9], 0  ;;  %s223_s15 = smov [#allocation2]   ;;  %s127_s19 = scalar_lea.hbm %s323_s0, 256 }
   0x4   :  { %s19_s16 = sshll.u32 %s223_s15, 4  ;;  %p128_p0 = scmp.ne.s32.totalorder %s323_s0, %s127_s19  ;;  %s20_s16 = int_to_ptr.vmem [resolvable:$true] %s19_s16 }
   0x5   :  { %p131_p1 = scmp.lt.u32.totalorder %s127_s19, %s323_s0 }
   0x7   :  { %p133_p2 = pnand %p131_p1, %p128_p0 }
   0x9   :  { %136 = shalt.err (!%p133_p2)
}
   0xa   :  { %s137_s24 = scalar_lea.vmem %s20_s16, 256  ;;  %p142_p4 = scmp.lt.s32.totalorder %s20_s16, %s20_s16 }
   0xb   :  { %p138_p3 = scmp.ne.s32.totalorder %s20_s16, %s137_s24  ;;  %p143_p5 = scmp.lt.s32.totalorder %s137_s24, %s137_s24 }
   0xd   :  { %p144_p6 = por %p143_p5, %p142_p4 }
   0xf   :  { %p145_p7 = pnand %p144_p6, %p138_p3 }
  0x11   :  { %148 = shalt.err (!%p145_p7)
}
  0x12   :  { %s224_s25 = smov 128   ;;  %s225_s26 = smov 8  }
  0x13   :  { %25 = dma.hbm_to_vmem [thread:$0]  %s323_s0, 256, %s20_s16, [#allocation3], %s224_s25, %s224_s25, %s225_s26  }
  0x14   :  { %s226_s29 = smov [#allocation5]   ;;  %s149_s7 = scalar_lea.hbm %s324_s1, 256 }
  0x15   :  { %s31_s30 = sshll.u32 %s226_s29, 4  ;;  %p150_p8 = scmp.ne.s32.totalorder %s324_s1, %s149_s7  ;;  %s32_s30 = int_to_ptr.vmem [resolvable:$true] %s31_s30 }
  0x16   :  { %p153_p9 = scmp.lt.u32.totalorder %s149_s7, %s324_s1 }
  0x18   :  { %p155_p10 = pnand %p153_p9, %p150_p8 }
  0x1a   :  { %158 = shalt.err (!%p155_p10)
}
  0x1b   :  { %s159_s12 = scalar_lea.vmem %s32_s30, 256  ;;  %p164_p12 = scmp.lt.s32.totalorder %s32_s30, %s32_s30 }
  0x1c   :  { %p160_p11 = scmp.ne.s32.totalorder %s32_s30, %s159_s12  ;;  %p165_p13 = scmp.lt.s32.totalorder %s159_s12, %s159_s12 }
  0x1e   :  { %p166_p0 = por %p165_p13, %p164_p12 }
  0x20   :  { %p167_p1 = pnand %p166_p0, %p160_p11 }
  0x22   :  { %170 = shalt.err (!%p167_p1)
}
  0x23   :  { %37 = dma.hbm_to_vmem [thread:$0]  %s324_s1, 256, %s32_s30, [#allocation6], %s224_s25, %s224_s25, %s225_s26  }
  0x24   :  { %215 = dma.done.wait [#allocation3], 256  }
  0x25   :  { %216 = vsyncadd [#allocation3], 4294967040 }
  0x26   :  { %217 = dma.done.wait [#allocation6], 256  }
  0x27   :  { %218 = vsyncadd [#allocation6], 4294967040  ;;  %v46_v0 = vld [vmem:[#allocation2] sm:$0xff]  ;;  %v48_v1 = vld [vmem:[#allocation5] sm:$0xff]  ;;  %vm52_vm0 = vcmask 261120   ;;  %s227_s1 = smov [#allocation8]  }
  0x28   :  { %v47_v2 = vld [vmem:[#allocation2 + $0x8] sm:$0xff]  ;;  %v50_v3 = vadd.f32 %v48_v1, %v46_v0  ;;  %v49_v4 = vld [vmem:[#allocation5 + $0x8] sm:$0xff]  ;;  %s99_s14 = sshll.u32 %s227_s1, 4  ;;  %s100_s14 = int_to_ptr.vmem [resolvable:$true] %s99_s14 }
  0x29   :  { %v51_v5 = vadd.f32 %v49_v4, %v47_v2  ;;  %s171_s15 = scalar_lea.vmem %s100_s14, 256  ;;  %p176_p3 = scmp.lt.s32.totalorder %s100_s14, %s100_s14 }
  0x2a   :  { %v55_v6 = vmul.f32 %v50_v3, %v50_v3  ;;  %53 = vst.msk [vmem:[#allocation8] sm:$0xff] %vm52_vm0, %v50_v3  ;;  %p172_p2 = scmp.ne.s32.totalorder %s100_s14, %s171_s15  ;;  %p177_p4 = scmp.lt.s32.totalorder %s171_s15, %s171_s15 }
  0x2b   :  { %v56_v7 = vmul.f32 %v51_v5, %v51_v5  ;;  %54 = vst.msk [vmem:[#allocation8 + $0x8] sm:$0xff] %vm52_vm0, %v51_v5 }
  0x2c   :  { %v57_v8 = vsel %vm52_vm0, %v55_v6, 0.0  ;;  %p178_p5 = por %p177_p4, %p176_p3 }
  0x2d   :  { %58 = vadd.xlane.f32.xlu0 %v57_v8  ;;  %v60_v9 = vsel %vm52_vm0, %v56_v7, 0.0 }
  0x2e   :  { %p179_p6 = pnand %p178_p5, %p172_p2 }
  0x31   :  { %61 = vadd.xlane.f32.xlu0 %v60_v9 }
  0x32   :  { %182 = shalt.err (!%p179_p6)
}
  0x33   :  { %s183_s18 = scalar_lea.hbm %s327_s4, 256 }
  0x34   :  { %p184_p7 = scmp.ne.s32.totalorder %s327_s4, %s183_s18  ;;  %p187_p8 = scmp.lt.u32.totalorder %s183_s18, %s327_s4 }
  0x36   :  { %p189_p9 = pnand %p187_p8, %p184_p7 }
  0x38   :  { %192 = shalt.err (!%p189_p9)
}
  0x39   :  { %105 = dma.vmem_to_hbm [thread:$0]  %s100_s14, 256, %s327_s4, [#allocation9], %s224_s25, %s224_s25, %s225_s26  }
  0x3a   :  { %v116_v17 = vld [vmem:[%s325_s2] ss:$0 sm:$0xff]  ;;  %s228_s29 = smov [#allocation7]  }
  0x3b   :  { %s87_s30 = sshll.u32 %s228_s29, 4  ;;  %s88_s30 = int_to_ptr.vmem [resolvable:$true] %s87_s30 }
  0x3c   :  { %s193_s4 = scalar_lea.vmem %s88_s30, 256  ;;  %p198_p11 = scmp.lt.s32.totalorder %s88_s30, %s88_s30 }
  0x3d   :  { %p194_p10 = scmp.ne.s32.totalorder %s88_s30, %s193_s4  ;;  %p199_p12 = scmp.lt.s32.totalorder %s193_s4, %s193_s4 }
  0x3f   :  { %p200_p13 = por %p199_p12, %p198_p11 }
  0x41   :  { %p201_p0 = pnand %p200_p13, %p194_p10 }
  0xba   :  { %v59_v10 = vpop.xlane.xlu0 %58 }
  0xbb   :  { %v63_v11 = vmul.f32 0.03125, %v59_v10 }
  0xbd   :  { %v65_v12 = vadd.f32 1e-06, %v63_v11 }
  0xbe   :  { %v62_v13 = vpop.xlane.xlu0 %61 }
  0xbf   :  { %123 = vrsqrt.f32 %v65_v12  ;;  %v64_v14 = vmul.f32 0.03125, %v62_v13 }
  0xc1   :  { %v66_v15 = vadd.f32 1e-06, %v64_v14 }
  0xc3   :  { %125 = vrsqrt.f32 %v66_v15 }
  0xc9   :  { %v124_v16 = vpop.eup %123 }
  0xca   :  { %v70_v18 = vmul.f32 %v124_v16, %v50_v3 }
  0xcc   :  { %v78_v19 = vmul.f32 %v116_v17, %v70_v18 }
  0xcd   :  { %v126_v20 = vpop.eup %125 }
  0xce   :  { %v71_v21 = vmul.f32 %v126_v20, %v51_v5  ;;  %80 = vst.msk [vmem:[#allocation7] sm:$0xff] %vm52_vm0, %v78_v19 }
  0xd0   :  { %v79_v22 = vmul.f32 %v116_v17, %v71_v21 }
  0xd2   :  { %81 = vst.msk [vmem:[#allocation7 + $0x8] sm:$0xff] %vm52_vm0, %v79_v22 }
  0xd3   :  { %204 = shalt.err (!%p201_p0)
}
  0xd4   :  { %s205_s6 = scalar_lea.hbm %s326_s3, 256 }
  0xd5   :  { %p206_p1 = scmp.ne.s32.totalorder %s326_s3, %s205_s6  ;;  %p209_p2 = scmp.lt.u32.totalorder %s205_s6, %s326_s3 }
  0xd7   :  { %p211_p3 = pnand %p209_p2, %p206_p1 }
  0xd9   :  { %214 = shalt.err (!%p211_p3)
}
  0xda   :  { %93 = dma.vmem_to_hbm [thread:$0]  %s88_s30, 256, %s326_s3, [#allocation4], %s224_s25, %s224_s25, %s225_s26  }
  0xdb   :  { %219 = dma.done.wait [#allocation4], 256  }
  0xdc   :  { %220 = vsyncadd [#allocation4], 4294967040 }
  0xdd   :  { %221 = dma.done.wait [#allocation9], 256  }
  0xde   :  { %222 = vsyncadd [#allocation9], 4294967040 }
  0xdf   :  { %112 = vsyncpa [#allocation3], 1 }
  0xe0   :  { %113 = vsyncpa [#allocation6], 1 }
  0xe1   :  { %114 = vsyncpa [#allocation4], 1 }
  0xe2   :  { %115 = vsyncpa [#allocation9], 1 }

</bundles_post_ra>
